<compile_context>
chip_gen: v7x
topology: tpu7x:2x2x1
jax: 0.10.0
libtpu: 0.0.40
codegen_flags: <defaults>
</compile_context>

<pallas_src>
import functools

import jax
import jax.numpy as jnp
from jax.experimental import pallas as pl
from jax.experimental.pallas import tpu as pltpu

BN_EPS = 1e-5
_LANE = 128                              # channel dims padded to multiples of this
_TILED_VMEM_LIMIT = 48 * 1024 * 1024     # tiled-path scoped VMEM (safe on v5e/v6e/v7x)


def _round_up(x, m):
    return ((x + m - 1) // m) * m


def _pad2d(x, rows, cols):
    return jnp.pad(x, ((0, rows - x.shape[0]), (0, cols - x.shape[1])))


def _pad1d(x, cols):
    return jnp.pad(x, (0, cols - x.shape[0]))


def _physical_vmem_bytes():
    """Best-effort physical VMEM query; conservative 64 MiB (v7x per-TC) fallback."""
    try:
        info = pltpu.get_tpu_info()
        cap = getattr(info, "vmem_capacity_bytes", None)
        if cap:
            return int(cap)
    except Exception:
        pass
    return 64 * 1024 * 1024


def _pick_tiles(n_nodes, c_pad):
    """Tile sizes for the tiled per-layer path.

    tk=256 fills the v6e/v7x 2x256x256 MXU (128 is already native on v5e, 256 still fine);
    tm grows with N so the mem-bound aggregate gets off the ~30%-of-roofline 128-tile regime,
    but stays small enough for small graphs that the M "parallel" extent keeps both v7x
    TensorCores busy.
    """
    tk = 256 if n_nodes > 256 else 128
    if n_nodes >= 2048:
        tm = 512
    elif n_nodes >= 512:
        tm = 256
    else:
        tm = 128
    tn = c_pad if c_pad <= 512 else 128
    return tm, tn, tk


# ---------------------------------------------------------------------------
# Fused whole-model kernel (small graphs: everything resident in VMEM)
# ---------------------------------------------------------------------------
def _resgcn_fused_kernel(a_ref, x_ref, w_ref, scale_ref, shift_ref, o_ref,
                         *, num_layers, mxu_dtype):
    """a:[Np,Np](mxu)  x:[Np,Cp](f32)  w:[L,Cp,Cp](mxu)  scale/shift:[L,1,Cp]  o:[Np,Cp]."""
    a = a_ref[...]                               # already mxu_dtype (pre-cast in wrapper)
    h = x_ref[...]
    for l in range(num_layers):                  # static unroll over layers
        xw = jnp.dot(h.astype(mxu_dtype), w_ref[l],
                     preferred_element_type=jnp.float32)
        agg = jnp.dot(a, xw.astype(mxu_dtype), preferred_element_type=jnp.float32)
        # folded (BN ∘ bias) affine epilogue
        h = agg * scale_ref[l] + shift_ref[l]
        if l < num_layers - 1:
            h = jnp.maximum(h, 0.0)              # ReLU; eval-mode dropout = identity
    o_ref[...] = h.astype(o_ref.dtype)


def resgcn_fused(a_p, x_p, w_stack, scale_stack, shift_stack, *,
                 num_layers, mxu_dtype, vmem_limit):
    n_pad, c_pad = x_p.shape
    kernel = functools.partial(_resgcn_fused_kernel,
                               num_layers=num_layers, mxu_dtype=mxu_dtype)
    vmem = pl.BlockSpec(memory_space=pltpu.MemorySpace.VMEM)
    return pl.pallas_call(
        kernel,
        out_shape=jax.ShapeDtypeStruct((n_pad, c_pad), jnp.float32),
        in_specs=[vmem] * 5,
        out_specs=vmem,
        compiler_params=pltpu.CompilerParams(vmem_limit_bytes=vmem_limit),
    )(a_p, x_p, w_stack, scale_stack, shift_stack)


# ---------------------------------------------------------------------------
# Tiled per-layer path (large graphs): fused (X@W) + (A@XW) + affine/ReLU
# ---------------------------------------------------------------------------
def _gcn_layer_kernel(a_ref, x_ref, w_ref, scale_ref, shift_ref, o_ref,
                      *, apply_relu, mxu_dtype):
    """out[i,j] = sum_k A[i,k] @ (X[k,:] @ W[:,j]), accumulated in the resident output block.

    The W block is constant over (i,k) so it stays resident; X@W is recomputed per row
    block of A (≈ C_in/tm extra MXU flops) which is far cheaper than streaming an fp32 XW
    through HBM every layer.
    """
    k = pl.program_id(2)

    @pl.when(k == 0)
    def _():
        o_ref[...] = jnp.zeros_like(o_ref)

    xw = jnp.dot(x_ref[...], w_ref[...], preferred_element_type=jnp.float32)
    o_ref[...] += jnp.dot(a_ref[...], xw.astype(mxu_dtype),
                          preferred_element_type=jnp.float32)

    @pl.when(k == pl.num_programs(2) - 1)
    def _():
        out = o_ref[...] * scale_ref[...] + shift_ref[...]
        if apply_relu:
            out = jnp.maximum(out, 0.0)
        o_ref[...] = out


def gcn_layer_tiled(a, x, w, scale, shift, *, apply_relu, tm, tn, tk, mxu_dtype):
    n = a.shape[0]
    c_in = x.shape[1]
    c_out = w.shape[1]
    kernel = functools.partial(_gcn_layer_kernel, apply_relu=apply_relu,
                               mxu_dtype=mxu_dtype)
    # If profiling shows exposed DMA on the k axis (A stream), add
    # pipeline_mode=pl.Buffered(3) to the A BlockSpec below.
    return pl.pallas_call(
        kernel,
        out_shape=jax.ShapeDtypeStruct((n, c_out), jnp.float32),
        grid_spec=pltpu.PrefetchScalarGridSpec(
            num_scalar_prefetch=0,
            grid=(n // tm, c_out // tn, n // tk),
            in_specs=[
                pl.BlockSpec((tm, tk), lambda i, j, k: (i, k)),      # A tile
                pl.BlockSpec((tk, c_in), lambda i, j, k: (k, 0)),    # X rows
                pl.BlockSpec((c_in, tn), lambda i, j, k: (0, j)),    # W panel (resident)
                pl.BlockSpec((1, tn), lambda i, j, k: (0, j)),       # scale
                pl.BlockSpec((1, tn), lambda i, j, k: (0, j)),       # shift
            ],
            out_specs=pl.BlockSpec((tm, tn), lambda i, j, k: (i, j))),
        compiler_params=pltpu.CompilerParams(
            dimension_semantics=("parallel", "parallel", "arbitrary"),
            vmem_limit_bytes=_TILED_VMEM_LIMIT),
    )(a, x, w, scale, shift)


# ---------------------------------------------------------------------------
# Graph normalization (plain-JAX glue), PyG gcn_norm parity
# ---------------------------------------------------------------------------
def build_normalized_adjacency(edge_index, num_nodes):
    """Dense A_hat = D^{-1/2}(A + missing self loops)D^{-1/2}, matching PyG gcn_norm."""
    src = edge_index[0]
    dst = edge_index[1]
    a = jnp.zeros((num_nodes, num_nodes), jnp.float32)
    # Scatter-ADD so duplicate edges accumulate (PyG message passing adds them).
    a = a.at[dst, src].add(1.0)
    # add_remaining_self_loops: only add a unit self-loop where none exists yet.
    diag = jnp.diagonal(a)
    a = a + jnp.diag(jnp.where(diag > 0.0, 0.0, 1.0))
    deg = a.sum(axis=1)                      # in-degree at dst incl. self loops
    dinv = jnp.where(deg > 0, jax.lax.rsqrt(deg), 0.0)
    return a * dinv[:, None] * dinv[None, :]


# ---------------------------------------------------------------------------
# Model wrapper
# ---------------------------------------------------------------------------
class ResGCNPallas:
    """Deterministic synthetic-parameter re-implementation of ResGCN (eval mode)."""

    def __init__(self, in_channels, hidden_channels, out_channels, num_layers,
                 dropout, key, mxu_dtype=jnp.float32):
        self.dropout = dropout
        self.mxu_dtype = mxu_dtype           # jnp.bfloat16 on v6e/v7x: halves A/W bytes
        self.dims = ([in_channels] + [hidden_channels] * (num_layers - 1)
                     + [out_channels])
        self.weights, self.biases = [], []
        self.bn_gamma, self.bn_beta, self.bn_mean, self.bn_var = [], [], [], []
        for i in range(num_layers):
            key, kw, kb = jax.random.split(key, 3)
            cin, cout = self.dims[i], self.dims[i + 1]
            self.weights.append(jax.random.normal(kw, (cin, cout), jnp.float32) * 0.1)
            self.biases.append(jax.random.normal(kb, (cout,), jnp.float32) * 0.01)
            if i < num_layers - 1:
                key, kg, kbe, km, kv = jax.random.split(key, 5)
                self.bn_gamma.append(1.0 + 0.1 * jax.random.normal(kg, (cout,), jnp.float32))
                self.bn_beta.append(0.1 * jax.random.normal(kbe, (cout,), jnp.float32))
                self.bn_mean.append(0.1 * jax.random.normal(km, (cout,), jnp.float32))
                self.bn_var.append(
                    1.0 + 0.1 * jnp.abs(jax.random.normal(kv, (cout,), jnp.float32)))

    def _folded_affines(self):
        """Fold BatchNorm (running stats) + conv bias into a single affine per layer."""
        scales, shifts = [], []
        num_layers = len(self.weights)
        for i in range(num_layers):
            b = self.biases[i]
            if i < num_layers - 1:
                s = self.bn_gamma[i] * jax.lax.rsqrt(self.bn_var[i] + BN_EPS)
                t = self.bn_beta[i] + (b - self.bn_mean[i]) * s
            else:
                s = jnp.ones_like(b)
                t = b
            scales.append(s)
            shifts.append(t)
        return scales, shifts

    def __call__(self, x, edge_index, *, force_tiled=False):
        n = x.shape[0]
        num_layers = len(self.weights)
        a_hat = build_normalized_adjacency(edge_index, n)
        scales, shifts = self._folded_affines()

        c_pad = _round_up(max(self.dims), _LANE)
        n_pad = _round_up(n, _LANE)          # 128: full-depth MXU contraction, bf16-safe tiles

        # VMEM estimate for the fused fully-resident path.
        mxu_bytes = jnp.dtype(self.mxu_dtype).itemsize
        fused_bytes = (
            n_pad * n_pad * mxu_bytes                    # A_hat (pre-cast)
            + num_layers * c_pad * c_pad * mxu_bytes     # stacked W (pre-cast)
            + 2 * n_pad * c_pad * 4                      # x input + output (f32)
            + 2 * num_layers * 8 * c_pad * 4             # scale/shift tiles
            + 3 * n_pad * c_pad * 4                      # live per-layer h / XW / agg (f32)
        )
        fused_budget = int(0.75 * _physical_vmem_bytes())   # ~96 MiB v5e/v6e, ~48 MiB v7x
        estimate = int(1.3 * fused_bytes) + (1 << 20)

        if (not force_tiled) and estimate <= fused_budget:
            return self._forward_fused(a_hat, x, scales, shifts, n_pad, c_pad, fused_budget)
        return self._forward_tiled(a_hat, x, scales, shifts, c_pad)

    # -- small graphs: single fused kernel ---------------------------------
    def _forward_fused(self, a_hat, x, scales, shifts, n_pad, c_pad, vmem_limit):
        n = x.shape[0]
        num_layers = len(self.weights)
        a_p = _pad2d(a_hat, n_pad, n_pad).astype(self.mxu_dtype)
        x_p = _pad2d(x, n_pad, c_pad)
        w_stack = jnp.stack(
            [_pad2d(w, c_pad, c_pad) for w in self.weights]).astype(self.mxu_dtype)
        scale_stack = jnp.stack([_pad1d(s, c_pad) for s in scales])[:, None, :]
        shift_stack = jnp.stack([_pad1d(t, c_pad) for t in shifts])[:, None, :]
        out = resgcn_fused(a_p, x_p, w_stack, scale_stack, shift_stack,
                           num_layers=num_layers, mxu_dtype=self.mxu_dtype,
                           vmem_limit=vmem_limit)
        return out[:n, :self.dims[-1]]

    # -- large graphs: tiled per-layer path (XW fused into the aggregate) ---
    def _forward_tiled(self, a_hat, x, scales, shifts, c_pad):
        n = x.shape[0]
        num_layers = len(self.weights)
        tm, tn, tk = _pick_tiles(n, c_pad)
        n_pad = _round_up(n, max(tm, tk))
        a_p = _pad2d(a_hat, n_pad, n_pad).astype(self.mxu_dtype)   # pre-cast once
        h = _pad2d(x, n_pad, c_pad)
        for i in range(num_layers):
            w_p = _pad2d(self.weights[i], c_pad, c_pad).astype(self.mxu_dtype)
            s_p = _pad1d(scales[i], c_pad)[None, :]
            t_p = _pad1d(shifts[i], c_pad)[None, :]
            h = gcn_layer_tiled(a_p, h.astype(self.mxu_dtype), w_p, s_p, t_p,
                                apply_relu=(i < num_layers - 1),
                                tm=tm, tn=tn, tk=tk, mxu_dtype=self.mxu_dtype)
        return h[:n, :self.dims[-1]]


if __name__ == "__main__":
    key = jax.random.PRNGKey(0)

    num_nodes = 16
    in_channels = 8
    hidden_channels = 32
    out_channels = 16
    num_layers = 3
    num_edges = 40

    key, kx, ke, kp = jax.random.split(key, 4)
    x = jax.random.normal(kx, (num_nodes, in_channels), jnp.float32)
    edge_index = jax.random.randint(ke, (2, num_edges), 0, num_nodes, dtype=jnp.int32)

    model = ResGCNPallas(in_channels, hidden_channels, out_channels,
                         num_layers, dropout=0.5, key=kp)

    # Small-graph path: one fused pallas_call for the whole layer stack (fp32, exact).
    out_fused = jax.block_until_ready(model(x, edge_index))
    assert out_fused.shape == (num_nodes, out_channels)
    assert jnp.all(jnp.isfinite(out_fused))

    # Cross-check the tiled (large-graph) path against the fused path.
    out_tiled = jax.block_until_ready(model(x, edge_index, force_tiled=True))
    assert out_tiled.shape == (num_nodes, out_channels)
    assert jnp.allclose(out_fused, out_tiled, atol=1e-4, rtol=1e-4)

    # bf16 MXU variant (same params): halves A_hat/W bytes, f32 accumulation preserved.
    model_bf16 = ResGCNPallas(in_channels, hidden_channels, out_channels,
                              num_layers, dropout=0.5, key=kp, mxu_dtype=jnp.bfloat16)
    out_bf16 = jax.block_until_ready(model_bf16(x, edge_index))
    assert out_bf16.shape == (num_nodes, out_channels)
    assert jnp.all(jnp.isfinite(out_bf16))

    print("KERNEL_OK")
</pallas_src>

<mosaic_0001>
module attributes {stable_mosaic.version = 11 : i64} {
  func.func @_resgcn_fused_kernel(%arg0: memref<128x128xf32, #tpu.memory_space<vmem>>, %arg1: memref<128x128xf32, #tpu.memory_space<vmem>>, %arg2: memref<3x128x128xf32, #tpu.memory_space<vmem>>, %arg3: memref<3x1x128xf32, #tpu.memory_space<vmem>>, %arg4: memref<3x1x128xf32, #tpu.memory_space<vmem>>, %arg5: memref<128x128xf32, #tpu.memory_space<vmem>>) attributes {dimension_semantics = [], scalar_prefetch = 0 : i64, scratch_operands = 0 : i64, tpu.core_type = #tpu.core_type<tc>} {
    %c0 = arith.constant 0 : index
    %c0_0 = arith.constant 0 : index
    %0 = vector.load %arg0[%c0, %c0_0] : memref<128x128xf32, #tpu.memory_space<vmem>>, vector<128x128xf32>
    %c0_1 = arith.constant 0 : index
    %c0_2 = arith.constant 0 : index
    %1 = vector.load %arg1[%c0_1, %c0_2] : memref<128x128xf32, #tpu.memory_space<vmem>>, vector<128x128xf32>
    %c0_3 = arith.constant 0 : index
    %c0_4 = arith.constant 0 : index
    %c0_5 = arith.constant 0 : index
    %2 = vector.load %arg2[%c0_3, %c0_4, %c0_5] : memref<3x128x128xf32, #tpu.memory_space<vmem>>, vector<1x128x128xf32>
    %3 = vector.shape_cast %2 : vector<1x128x128xf32> to vector<128x128xf32>
    %cst = arith.constant dense<0.000000e+00> : vector<128x128xf32>
    %4 = tpu.matmul %1, %3, %cst {dimension_numbers = #tpu.dot_dimension_numbers<[1], [0], [0], [1], [0, 0, 1, 1], [], []>} : vector<128x128xf32>, vector<128x128xf32>, vector<128x128xf32> -> vector<128x128xf32>
    %cst_6 = arith.constant dense<0.000000e+00> : vector<128x128xf32>
    %5 = tpu.matmul %0, %4, %cst_6 {dimension_numbers = #tpu.dot_dimension_numbers<[1], [0], [0], [1], [0, 0, 1, 1], [], []>} : vector<128x128xf32>, vector<128x128xf32>, vector<128x128xf32> -> vector<128x128xf32>
    %c0_7 = arith.constant 0 : index
    %c0_8 = arith.constant 0 : index
    %c0_9 = arith.constant 0 : index
    %6 = vector.load %arg3[%c0_7, %c0_8, %c0_9] : memref<3x1x128xf32, #tpu.memory_space<vmem>>, vector<1x1x128xf32>
    %7 = vector.shape_cast %6 : vector<1x1x128xf32> to vector<1x128xf32>
    %8 = vector.broadcast %7 : vector<1x128xf32> to vector<128x128xf32>
    %9 = arith.mulf %5, %8 : vector<128x128xf32>
    %c0_10 = arith.constant 0 : index
    %c0_11 = arith.constant 0 : index
    %c0_12 = arith.constant 0 : index
    %10 = vector.load %arg4[%c0_10, %c0_11, %c0_12] : memref<3x1x128xf32, #tpu.memory_space<vmem>>, vector<1x1x128xf32>
    %11 = vector.shape_cast %10 : vector<1x1x128xf32> to vector<1x128xf32>
    %12 = vector.broadcast %11 : vector<1x128xf32> to vector<128x128xf32>
    %13 = arith.addf %9, %12 : vector<128x128xf32>
    %cst_13 = arith.constant 0.000000e+00 : f32
    %14 = vector.broadcast %cst_13 : f32 to vector<128x128xf32>
    %15 = arith.maximumf %13, %14 : vector<128x128xf32>
    %c1 = arith.constant 1 : index
    %c0_14 = arith.constant 0 : index
    %c0_15 = arith.constant 0 : index
    %16 = vector.load %arg2[%c1, %c0_14, %c0_15] : memref<3x128x128xf32, #tpu.memory_space<vmem>>, vector<1x128x128xf32>
    %17 = vector.shape_cast %16 : vector<1x128x128xf32> to vector<128x128xf32>
    %cst_16 = arith.constant dense<0.000000e+00> : vector<128x128xf32>
    %18 = tpu.matmul %15, %17, %cst_16 {dimension_numbers = #tpu.dot_dimension_numbers<[1], [0], [0], [1], [0, 0, 1, 1], [], []>} : vector<128x128xf32>, vector<128x128xf32>, vector<128x128xf32> -> vector<128x128xf32>
    %cst_17 = arith.constant dense<0.000000e+00> : vector<128x128xf32>
    %19 = tpu.matmul %0, %18, %cst_17 {dimension_numbers = #tpu.dot_dimension_numbers<[1], [0], [0], [1], [0, 0, 1, 1], [], []>} : vector<128x128xf32>, vector<128x128xf32>, vector<128x128xf32> -> vector<128x128xf32>
    %c1_18 = arith.constant 1 : index
    %c0_19 = arith.constant 0 : index
    %c0_20 = arith.constant 0 : index
    %20 = vector.load %arg3[%c1_18, %c0_19, %c0_20] : memref<3x1x128xf32, #tpu.memory_space<vmem>>, vector<1x1x128xf32>
    %21 = vector.shape_cast %20 : vector<1x1x128xf32> to vector<1x128xf32>
    %22 = vector.broadcast %21 : vector<1x128xf32> to vector<128x128xf32>
    %23 = arith.mulf %19, %22 : vector<128x128xf32>
    %c1_21 = arith.constant 1 : index
    %c0_22 = arith.constant 0 : index
    %c0_23 = arith.constant 0 : index
    %24 = vector.load %arg4[%c1_21, %c0_22, %c0_23] : memref<3x1x128xf32, #tpu.memory_space<vmem>>, vector<1x1x128xf32>
    %25 = vector.shape_cast %24 : vector<1x1x128xf32> to vector<1x128xf32>
    %26 = vector.broadcast %25 : vector<1x128xf32> to vector<128x128xf32>
    %27 = arith.addf %23, %26 : vector<128x128xf32>
    %cst_24 = arith.constant 0.000000e+00 : f32
    %28 = vector.broadcast %cst_24 : f32 to vector<128x128xf32>
    %29 = arith.maximumf %27, %28 : vector<128x128xf32>
    %c2 = arith.constant 2 : index
    %c0_25 = arith.constant 0 : index
    %c0_26 = arith.constant 0 : index
    %30 = vector.load %arg2[%c2, %c0_25, %c0_26] : memref<3x128x128xf32, #tpu.memory_space<vmem>>, vector<1x128x128xf32>
    %31 = vector.shape_cast %30 : vector<1x128x128xf32> to vector<128x128xf32>
    %cst_27 = arith.constant dense<0.000000e+00> : vector<128x128xf32>
    %32 = tpu.matmul %29, %31, %cst_27 {dimension_numbers = #tpu.dot_dimension_numbers<[1], [0], [0], [1], [0, 0, 1, 1], [], []>} : vector<128x128xf32>, vector<128x128xf32>, vector<128x128xf32> -> vector<128x128xf32>
    %cst_28 = arith.constant dense<0.000000e+00> : vector<128x128xf32>
    %33 = tpu.matmul %0, %32, %cst_28 {dimension_numbers = #tpu.dot_dimension_numbers<[1], [0], [0], [1], [0, 0, 1, 1], [], []>} : vector<128x128xf32>, vector<128x128xf32>, vector<128x128xf32> -> vector<128x128xf32>
    %c2_29 = arith.constant 2 : index
    %c0_30 = arith.constant 0 : index
    %c0_31 = arith.constant 0 : index
    %34 = vector.load %arg3[%c2_29, %c0_30, %c0_31] : memref<3x1x128xf32, #tpu.memory_space<vmem>>, vector<1x1x128xf32>
    %35 = vector.shape_cast %34 : vector<1x1x128xf32> to vector<1x128xf32>
    %36 = vector.broadcast %35 : vector<1x128xf32> to vector<128x128xf32>
    %37 = arith.mulf %33, %36 : vector<128x128xf32>
    %c2_32 = arith.constant 2 : index
    %c0_33 = arith.constant 0 : index
    %c0_34 = arith.constant 0 : index
    %38 = vector.load %arg4[%c2_32, %c0_33, %c0_34] : memref<3x1x128xf32, #tpu.memory_space<vmem>>, vector<1x1x128xf32>
    %39 = vector.shape_cast %38 : vector<1x1x128xf32> to vector<1x128xf32>
    %40 = vector.broadcast %39 : vector<1x128xf32> to vector<128x128xf32>
    %41 = arith.addf %37, %40 : vector<128x128xf32>
    %c0_35 = arith.constant 0 : index
    %c0_36 = arith.constant 0 : index
    %42 = vector.load %arg5[%c0_35, %c0_36] : memref<128x128xf32, #tpu.memory_space<vmem>>, vector<128x128xf32>
    tpu.vector_store %arg5[%c0_35, %c0_36], %41 {strides = array<i32>} : memref<128x128xf32, #tpu.memory_space<vmem>>, vector<128x128xf32>,
    return
  }
}

</mosaic_0001>

<bundles_post_ra>
// kernel: tpu_custom_call.1
= control target key start
LH: loop header
LB: loop body
LE: loop exit
PB: predicated region body
PF: predicated region fallthrough
CT: control target
= control target key end

     0   :  { %10 = vsyncpa [#allocation3], 0  ;;  %s2361_s0 = inlined_call_operand.hbm [shape: f32[128,128], index: 0, kind: input, shape index: {}]   ;;  %s2362_s1 = inlined_call_operand.hbm [shape: f32[128,128], index: 1, kind: input, shape index: {}]   ;;  %s2363_s2 = inlined_call_operand.hbm [shape: f32[3,128,128], index: 2, kind: input, shape index: {}]   ;;  %s2364_s3 = inlined_call_operand.vmem [shape: f32[3,1,128], index: 3, kind: input, shape index: {}]   ;;  %s2365_s4 = inlined_call_operand.vmem [shape: f32[3,1,128], index: 4, kind: input, shape index: {}]   ;;  %s2366_s5 = inlined_call_operand.hbm [shape: f32[128,128], index: 5, kind: output, shape index: {}]  }
   0x1   :  { %11 = vsyncpa [#allocation6], 0 }
   0x2   :  { %12 = vsyncpa [#allocation4], 0  ;;  %s2052_s18 = smov [#allocation5]   ;;  %s2053_s20 = smov [#allocation2]  }
   0x3   :  { %s30_s19 = sshll.u32 %s2052_s18, 4  ;;  %s18_s21 = sshll.u32 %s2053_s20, 4  ;;  %s31_s19 = int_to_ptr.vmem [resolvable:$true] %s30_s19  ;;  %s2088_s21 = int_to_ptr.vmem [resolvable:$true] %s18_s21 }
   0x4   :  { %s1958_s24 = scalar_lea.hbm %s2362_s1, 2048 }
   0x5   :  { %p1959_p0 = scmp.ne.s32.totalorder %s2362_s1, %s1958_s24  ;;  %p1962_p1 = scmp.lt.u32.totalorder %s1958_s24, %s2362_s1 }
   0x7   :  { %p1964_p2 = pnand %p1962_p1, %p1959_p0 }
   0x9   :  { %1967 = shalt.err (!%p1964_p2)
}
   0xa   :  { %s1968_s29 = scalar_lea.vmem %s31_s19, 2048  ;;  %p1973_p4 = scmp.lt.s32.totalorder %s31_s19, %s31_s19 }
   0xb   :  { %p1969_p3 = scmp.ne.s32.totalorder %s31_s19, %s1968_s29  ;;  %p1974_p5 = scmp.lt.s32.totalorder %s1968_s29, %s1968_s29 }
   0xd   :  { %p1975_p6 = por %p1974_p5, %p1973_p4 }
   0xf   :  { %p1976_p7 = pnand %p1975_p6, %p1969_p3 }
  0x11   :  { %1979 = shalt.err (!%p1976_p7)
}
  0x12   :  { %s2054_s30 = smov 128   ;;  %s2055_s6 = smov 8  }
  0x13   :  { %36 = dma.hbm_to_vmem [thread:$0]  %s2362_s1, 2048, %s31_s19, [#allocation6], %s2054_s30, %s2054_s30, %s2055_s6  }
  0x14   :  { %s1980_s11 = scalar_lea.hbm %s2361_s0, 2048 }
  0x15   :  { %p1981_p8 = scmp.ne.s32.totalorder %s2361_s0, %s1980_s11  ;;  %p1984_p9 = scmp.lt.u32.totalorder %s1980_s11, %s2361_s0 }
  0x17   :  { %p1986_p10 = pnand %p1984_p9, %p1981_p8 }
  0x19   :  { %1989 = shalt.err (!%p1986_p10)
}
  0x1a   :  { %s1990_s16 = scalar_lea.vmem %s2088_s21, 2048  ;;  %p1995_p12 = scmp.lt.s32.totalorder %s2088_s21, %s2088_s21 }
  0x1b   :  { %p1991_p11 = scmp.ne.s32.totalorder %s2088_s21, %s1990_s16  ;;  %p1996_p13 = scmp.lt.s32.totalorder %s1990_s16, %s1990_s16 }
  0x1d   :  { %p1997_p0 = por %p1996_p13, %p1995_p12 }
  0x1f   :  { %p1998_p1 = pnand %p1997_p0, %p1991_p11 }
  0x21   :  { %2001 = shalt.err (!%p1998_p1)
}
  0x22   :  { %24 = dma.hbm_to_vmem [thread:$0]  %s2361_s0, 2048, %s2088_s21, [#allocation3], %s2054_s30, %s2054_s30, %s2055_s6  }
  0x23   :  { %s2056_s18 = smov [#allocation7]   ;;  %s2002_s23 = scalar_lea.hbm %s2363_s2, 6144 }
  0x24   :  { %s42_s19 = sshll.u32 %s2056_s18, 4  ;;  %p2003_p2 = scmp.ne.s32.totalorder %s2363_s2, %s2002_s23  ;;  %s43_s19 = int_to_ptr.vmem [resolvable:$true] %s42_s19 }
  0x25   :  { %p2006_p3 = scmp.lt.u32.totalorder %s2002_s23, %s2363_s2 }
  0x27   :  { %p2008_p4 = pnand %p2006_p3, %p2003_p2 }
  0x29   :  { %2011 = shalt.err (!%p2008_p4)
}
  0x2a   :  { %s2012_s28 = scalar_lea.vmem %s43_s19, 6144  ;;  %p2017_p6 = scmp.lt.s32.totalorder %s43_s19, %s43_s19 }
  0x2b   :  { %p2013_p5 = scmp.ne.s32.totalorder %s43_s19, %s2012_s28  ;;  %p2018_p7 = scmp.lt.s32.totalorder %s2012_s28, %s2012_s28 }
  0x2d   :  { %p2019_p8 = por %p2018_p7, %p2017_p6 }
  0x2f   :  { %p2020_p9 = pnand %p2019_p8, %p2013_p5 }
  0x31   :  { %2023 = shalt.err (!%p2020_p9)
}
  0x32   :  { %48 = dma.hbm_to_vmem [thread:$0]  %s2363_s2, 6144, %s43_s19, [#allocation6], %s2054_s30, %s2054_s30, %s2055_s6  }
  0x33   :  { %2046 = dma.done.wait [#allocation3], 2048  }
  0x34   :  { %2047 = vsyncadd [#allocation3], 4294965248 }
  0x35   :  { %2048 = dma.done.wait [#allocation6], 8192  }
  0x36   :  { %2049 = vsyncadd [#allocation6], 4294959104  ;;  %v94_v0 = vld [vmem:[#allocation7] sm:$0xff]  ;;  %v95_v1 = vld [vmem:[#allocation7 + $0x8] sm:$0xff] }
  0x37   :  { %v96_v2 = vld [vmem:[#allocation7 + $0x10] sm:$0xff]  ;;  %v1760_v3 = vpack.c.bf16 %v95_v1, %v94_v0  ;;  %v97_v4 = vld [vmem:[#allocation7 + $0x18] sm:$0xff]  ;;  %v98_v6 = vld [vmem:[#allocation7 + $0x20] sm:$0xff] }
  0x38   :  { %v1764_v5 = vpack.c.bf16 %v97_v4, %v96_v2  ;;  %v99_v7 = vld [vmem:[#allocation7 + $0x28] sm:$0xff]  ;;  %v78_v9 = vld [vmem:[#allocation5] sm:$0xff]  ;;  %v100_v10 = vld [vmem:[#allocation7 + $0x30] sm:$0xff] }
  0x39   :  { %1761 = vmatprep.subr.bf16.mxu0 %v1760_v3  ;;  %v1768_v8 = vpack.c.bf16 %v99_v7, %v98_v6  ;;  %v101_v11 = vld [vmem:[#allocation7 + $0x38] sm:$0xff]  ;;  %1456 = vmatprep.mubr.f32.mxu0 %v78_v9  ;;  %v102_v13 = vld [vmem:[#allocation7 + $0x40] sm:$0xff]  ;;  %v103_v14 = vld [vmem:[#allocation7 + $0x48] sm:$0xff] }
  0x3a   :  { %1763 = vmatpush3.bf16.msra.mxu0 %v1760_v3  ;;  %v1772_v12 = vpack.c.bf16 %v101_v11, %v100_v10  ;;  %v1776_v15 = vpack.c.bf16 %v103_v14, %v102_v13  ;;  %v104_v16 = vld [vmem:[#allocation7 + $0x50] sm:$0xff]  ;;  %v105_v17 = vld [vmem:[#allocation7 + $0x58] sm:$0xff]  ;;  %v106_v19 = vld [vmem:[#allocation7 + $0x60] sm:$0xff] }
  0x3b   :  { %1765 = vmatprep.subr.bf16.mxu0 %v1764_v5  ;;  %v1780_v18 = vpack.c.bf16 %v105_v17, %v104_v16  ;;  %v107_v20 = vld [vmem:[#allocation7 + $0x68] sm:$0xff]  ;;  %v108_v22 = vld [vmem:[#allocation7 + $0x70] sm:$0xff]  ;;  %v109_v23 = vld [vmem:[#allocation7 + $0x78] sm:$0xff] }
  0x3c   :  { %v1784_v21 = vpack.c.bf16 %v107_v20, %v106_v19  ;;  %v1788_v24 = vpack.c.bf16 %v109_v23, %v108_v22  ;;  %v79_v25 = vld [vmem:[#allocation5 + $0x8] sm:$0xff]  ;;  %v80_v26 = vld [vmem:[#allocation5 + $0x10] sm:$0xff]  ;;  %v81_v27 = vld [vmem:[#allocation5 + $0x18] sm:$0xff] }
  0x3d   :  { %v82_v28 = vld [vmem:[#allocation5 + $0x20] sm:$0xff]  ;;  %v83_v29 = vld [vmem:[#allocation5 + $0x28] sm:$0xff]  ;;  %v84_v30 = vld [vmem:[#allocation5 + $0x30] sm:$0xff] }
  0x3e   :  { %1767 = vmatpush3.bf16.msra.mxu0 %v1764_v5  ;;  %v85_v31 = vld [vmem:[#allocation5 + $0x38] sm:$0xff]  ;;  %v86_v32 = vld [vmem:[#allocation5 + $0x40] sm:$0xff]  ;;  %v87_v33 = vld [vmem:[#allocation5 + $0x48] sm:$0xff] }
  0x3f   :  { %1769 = vmatprep.subr.bf16.mxu0 %v1768_v8  ;;  %v88_v34 = vld [vmem:[#allocation5 + $0x50] sm:$0xff]  ;;  %v89_v35 = vld [vmem:[#allocation5 + $0x58] sm:$0xff]  ;;  %v90_v36 = vld [vmem:[#allocation5 + $0x60] sm:$0xff] }
  0x40   :  { %v91_v37 = vld [vmem:[#allocation5 + $0x68] sm:$0xff]  ;;  %v92_v38 = vld [vmem:[#allocation5 + $0x70] sm:$0xff]  ;;  %v93_v39 = vld [vmem:[#allocation5 + $0x78] sm:$0xff] }
  0x41   :  { %v2140_v40 = vld [vmem:[#allocation2] sm:$0xff]  ;;  %v464_v42 = vld [vmem:[#allocation7 + $0x88] sm:$0xff]  ;;  %v465_v43 = vld [vmem:[#allocation7 + $0x90] sm:$0xff] }
  0x42   :  { %1771 = vmatpush3.bf16.msra.mxu0 %v1768_v8  ;;  %1512 = vmatprep.mubr.f32.mxu1 %v2140_v40  ;;  %v463_v41 = vld [vmem:[#allocation7 + $0x80] sm:$0xff]  ;;  %v466_v45 = vld [vmem:[#allocation7 + $0x98] sm:$0xff]  ;;  %v468_v48 = vld [vmem:[#allocation7 + $0xa8] sm:$0xff] }
  0x43   :  { %1773 = vmatprep.subr.bf16.mxu0 %v1772_v12  ;;  %v1824_v44 = vpack.c.bf16 %v464_v42, %v463_v41  ;;  %v1828_v46 = vpack.c.bf16 %v466_v45, %v465_v43  ;;  %v467_v47 = vld [vmem:[#allocation7 + $0xa0] sm:$0xff]  ;;  %v469_v50 = vld [vmem:[#allocation7 + $0xb0] sm:$0xff]  ;;  %v470_v51 = vld [vmem:[#allocation7 + $0xb8] sm:$0xff] }
  0x44   :  { %v1832_v49 = vpack.c.bf16 %v468_v48, %v467_v47  ;;  %v1836_v52 = vpack.c.bf16 %v470_v51, %v469_v50  ;;  %v471_v53 = vld [vmem:[#allocation7 + $0xc0] sm:$0xff]  ;;  %v472_v54 = vld [vmem:[#allocation7 + $0xc8] sm:$0xff]  ;;  %v473_v56 = vld [vmem:[#allocation7 + $0xd0] sm:$0xff] }
  0x45   :  { %v1840_v55 = vpack.c.bf16 %v472_v54, %v471_v53  ;;  %v474_v57 = vld [vmem:[#allocation7 + $0xd8] sm:$0xff]  ;;  %v2143_v19 = vld [vmem:[#allocation2 + $0x8] sm:$0xff]  ;;  %v2145_v20 = vld [vmem:[#allocation2 + $0x10] sm:$0xff] }
  0x46   :  { %1775 = vmatpush3.bf16.msra.mxu0 %v1772_v12  ;;  %v1844_v58 = vpack.c.bf16 %v474_v57, %v473_v56  ;;  %v2151_v22 = vld [vmem:[#allocation2 + $0x20] sm:$0xff]  ;;  %v2155_v23 = vld [vmem:[#allocation2 + $0x28] sm:$0xff] }
  0x47   :  { %1777 = vmatprep.subr.bf16.mxu0 %v1776_v15  ;;  %v2192_v41 = vld [vmem:[%s2364_s3] ss:$0 sm:$0xff] }
  0x48   :  { %v2197_v43 = vld [vmem:[%s2365_s4] ss:$0 sm:$0xff] }
  0x4a   :  { %1779 = vmatpush3.bf16.msra.mxu0 %v1776_v15 }
  0x4b   :  { %1781 = vmatprep.subr.bf16.mxu0 %v1780_v18 }
  0x4e   :  { %1783 = vmatpush3.bf16.msra.mxu0 %v1780_v18 }
  0x4f   :  { %1785 = vmatprep.subr.bf16.mxu0 %v1784_v21 }
  0x52   :  { %1787 = vmatpush3.bf16.msra.mxu0 %v1784_v21  ;;  %v2149_v21 = vld [vmem:[#allocation2 + $0x18] sm:$0xff] }
  0x53   :  { %1789 = vmatprep.subr.bf16.mxu0 %v1788_v24 }
  0x56   :  { %1791 = vmatpush3.bf16.msra.mxu0 %v1788_v24  ;;  %v2157_v24 = vld [vmem:[#allocation2 + $0x30] sm:$0xff] }
  0x57   :  { %1825 = vmatprep.subr.bf16.mxu0 %v1824_v44 }
  0x59   :  { %1457 = vmatmul.mubr.f32.vlgmr.msra.gmra.mrb[0].mxu0 %v79_v25  ;;  %v2161_v25 = vld [vmem:[#allocation2 + $0x38] sm:$0xff] }
  0x5a   :  { %1459 = vmatprep.mubr.f32.mxu0 %v80_v26  ;;  %1827 = vmatpush3.bf16.msra.mxu0 %v1824_v44  ;;  %v2163_v26 = vld [vmem:[#allocation2 + $0x40] sm:$0xff] }
  0x5b   :  { %1829 = vmatprep.subr.bf16.mxu0 %v1828_v46 }
  0x5d   :  { %1460 = vmatmul.mubr.f32.gmra.mrb[2].mxu0 %v81_v27  ;;  %v2167_v27 = vld [vmem:[#allocation2 + $0x48] sm:$0xff] }
  0x5e   :  { %1462 = vmatprep.mubr.f32.mxu0 %v82_v28  ;;  %1831 = vmatpush3.bf16.msra.mxu0 %v1828_v46  ;;  %v2169_v28 = vld [vmem:[#allocation2 + $0x50] sm:$0xff] }
  0x5f   :  { %1833 = vmatprep.subr.bf16.mxu0 %v1832_v49 }
  0x61   :  { %1463 = vmatmul.mubr.f32.gmra.mrb[4].mxu0 %v83_v29  ;;  %v2173_v29 = vld [vmem:[#allocation2 + $0x58] sm:$0xff] }
  0x62   :  { %1465 = vmatprep.mubr.f32.mxu0 %v84_v30  ;;  %1835 = vmatpush3.bf16.msra.mxu0 %v1832_v49  ;;  %v2175_v30 = vld [vmem:[#allocation2 + $0x60] sm:$0xff] }
  0x63   :  { %1837 = vmatprep.subr.bf16.mxu0 %v1836_v52 }
  0x65   :  { %1466 = vmatmul.mubr.f32.gmra.mrb[6].mxu0 %v85_v31  ;;  %v2179_v31 = vld [vmem:[#allocation2 + $0x68] sm:$0xff] }
  0x66   :  { %1468 = vmatprep.mubr.f32.mxu0 %v86_v32  ;;  %1839 = vmatpush3.bf16.msra.mxu0 %v1836_v52  ;;  %v2181_v32 = vld [vmem:[#allocation2 + $0x70] sm:$0xff] }
  0x67   :  { %1841 = vmatprep.subr.bf16.mxu0 %v1840_v55 }
  0x69   :  { %1469 = vmatmul.mubr.f32.gmra.mrb[8].mxu0 %v87_v33  ;;  %v2185_v33 = vld [vmem:[#allocation2 + $0x78] sm:$0xff] }
  0x6a   :  { %1471 = vmatprep.mubr.f32.mxu0 %v88_v34  ;;  %1843 = vmatpush3.bf16.msra.mxu0 %v1840_v55  ;;  %v475_v34 = vld [vmem:[#allocation7 + $0xe0] sm:$0xff] }
  0x6b   :  { %1845 = vmatprep.subr.bf16.mxu0 %v1844_v58 }
  0x6d   :  { %1472 = vmatmul.mubr.f32.gmra.mrb[10].mxu0 %v89_v35  ;;  %v476_v35 = vld [vmem:[#allocation7 + $0xe8] sm:$0xff] }
  0x6e   :  { %1474 = vmatprep.mubr.f32.mxu0 %v90_v36  ;;  %1847 = vmatpush3.bf16.msra.mxu0 %v1844_v58  ;;  %v1848_v36 = vpack.c.bf16 %v476_v35, %v475_v34 }
  0x70   :  { %1849 = vmatprep.subr.bf16.mxu0 %v1848_v36 }
  0x71   :  { %1475 = vmatmul.mubr.f32.gmra.mrb[12].mxu0 %v91_v37  ;;  %v477_v37 = vld [vmem:[#allocation7 + $0xf0] sm:$0xff] }
  0x72   :  { %1477 = vmatprep.mubr.f32.mxu0 %v92_v38  ;;  %1851 = vmatpush3.bf16.msra.mxu0 %v1848_v36  ;;  %v478_v38 = vld [vmem:[#allocation7 + $0xf8] sm:$0xff] }
  0x75   :  { %1478 = vmatmul.mubr.f32.gmra.mrb[14].mxu0 %v93_v39  ;;  %v1852_v39 = vpack.c.bf16 %v478_v38, %v477_v37 }
  0x77   :  { %1853 = vmatprep.subr.bf16.mxu0 %v1852_v39 }
  0x78   :  { %1855 = vmatpush3.bf16.msra.mxu0 %v1852_v39 }
 0x12c   :  { %v1458_v59 = vpop.f32.mrb[0].mxu0 }
 0x12d   :  { %v176_v60 = vpop.f32.mrb[1].mxu0 }
 0x12e   :  { %v1792_v61 = vpack.c.bf16 %v1458_v59, %v176_v60 }
 0x130   :  { %v1461_v62 = vpop.f32.mrb[2].mxu0  ;;  %1793 = vmatprep.subr.bf16.mxu1 %v1792_v61 }
 0x131   :  { %v186_v63 = vpop.f32.mrb[3].mxu0  ;;  %1795 = vmatpush3.bf16.msra.mxu1 %v1792_v61 }
 0x132   :  { %v1796_v0 = vpack.c.bf16 %v1461_v62, %v186_v63 }
 0x134   :  { %v1464_v1 = vpop.f32.mrb[4].mxu0  ;;  %1797 = vmatprep.subr.bf16.mxu1 %v1796_v0 }
 0x135   :  { %v196_v2 = vpop.f32.mrb[5].mxu0  ;;  %1799 = vmatpush3.bf16.msra.mxu1 %v1796_v0 }
 0x136   :  { %v1800_v3 = vpack.c.bf16 %v1464_v1, %v196_v2 }
 0x138   :  { %v1467_v4 = vpop.f32.mrb[6].mxu0  ;;  %1801 = vmatprep.subr.bf16.mxu1 %v1800_v3 }
 0x139   :  { %v206_v5 = vpop.f32.mrb[7].mxu0  ;;  %1803 = vmatpush3.bf16.msra.mxu1 %v1800_v3 }
 0x13a   :  { %v1804_v6 = vpack.c.bf16 %v1467_v4, %v206_v5 }
 0x13c   :  { %v1470_v7 = vpop.f32.mrb[8].mxu0  ;;  %1805 = vmatprep.subr.bf16.mxu1 %v1804_v6 }
 0x13d   :  { %v216_v8 = vpop.f32.mrb[9].mxu0  ;;  %1807 = vmatpush3.bf16.msra.mxu1 %v1804_v6 }
 0x13e   :  { %v1808_v9 = vpack.c.bf16 %v1470_v7, %v216_v8 }
 0x140   :  { %v1473_v10 = vpop.f32.mrb[10].mxu0  ;;  %1809 = vmatprep.subr.bf16.mxu1 %v1808_v9 }
 0x141   :  { %v226_v11 = vpop.f32.mrb[11].mxu0  ;;  %1811 = vmatpush3.bf16.msra.mxu1 %v1808_v9 }
 0x142   :  { %v1812_v12 = vpack.c.bf16 %v1473_v10, %v226_v11 }
 0x144   :  { %v1476_v13 = vpop.f32.mrb[12].mxu0  ;;  %1813 = vmatprep.subr.bf16.mxu1 %v1812_v12 }
 0x145   :  { %v236_v14 = vpop.f32.mrb[13].mxu0  ;;  %1815 = vmatpush3.bf16.msra.mxu1 %v1812_v12 }
 0x146   :  { %v1816_v15 = vpack.c.bf16 %v1476_v13, %v236_v14 }
 0x148   :  { %v1479_v16 = vpop.f32.mrb[14].mxu0  ;;  %1817 = vmatprep.subr.bf16.mxu1 %v1816_v15 }
 0x149   :  { %v246_v17 = vpop.f32.mrb[15].mxu0  ;;  %1819 = vmatpush3.bf16.msra.mxu1 %v1816_v15 }
 0x14a   :  { %v1820_v18 = vpack.c.bf16 %v1479_v16, %v246_v17 }
 0x14c   :  { %1821 = vmatprep.subr.bf16.mxu1 %v1820_v18 }
 0x14d   :  { %1823 = vmatpush3.bf16.msra.mxu1 %v1820_v18 }
 0x150   :  { %1513 = vmatmul.mubr.f32.vlgmr.msra.gmra.mrb[0].mxu1 %v2143_v19 }
 0x151   :  { %1515 = vmatprep.mubr.f32.mxu1 %v2145_v20 }
 0x154   :  { %1516 = vmatmul.mubr.f32.gmra.mrb[2].mxu1 %v2149_v21 }
 0x155   :  { %1518 = vmatprep.mubr.f32.mxu1 %v2151_v22 }
 0x158   :  { %1519 = vmatmul.mubr.f32.gmra.mrb[4].mxu1 %v2155_v23 }
 0x159   :  { %1521 = vmatprep.mubr.f32.mxu1 %v2157_v24 }
 0x15c   :  { %1522 = vmatmul.mubr.f32.gmra.mrb[6].mxu1 %v2161_v25 }
 0x15d   :  { %1524 = vmatprep.mubr.f32.mxu1 %v2163_v26 }
 0x160   :  { %1525 = vmatmul.mubr.f32.gmra.mrb[8].mxu1 %v2167_v27 }
 0x161   :  { %1527 = vmatprep.mubr.f32.mxu1 %v2169_v28 }
 0x164   :  { %1528 = vmatmul.mubr.f32.gmra.mrb[10].mxu1 %v2173_v29 }
 0x165   :  { %1530 = vmatprep.mubr.f32.mxu1 %v2175_v30 }
 0x168   :  { %1531 = vmatmul.mubr.f32.gmra.mrb[12].mxu1 %v2179_v31 }
 0x169   :  { %1533 = vmatprep.mubr.f32.mxu1 %v2181_v32 }
 0x16c   :  { %1534 = vmatmul.mubr.f32.gmra.mrb[14].mxu1 %v2185_v33 }
 0x16d   :  { %1624 = vmatprep.mubr.f32.mxu1 %v2140_v40 }
 0x223   :  { %v1514_v42 = vpop.f32.mrb[0].mxu1 }
 0x224   :  { %v408_v44 = vmul.f32 %v1514_v42, %v2192_v41  ;;  %v321_v45 = vpop.f32.mrb[1].mxu1 }
 0x225   :  { %v407_v46 = vmul.f32 %v2192_v41, %v321_v45 }
 0x226   :  { %v431_v47 = vadd.f32 %v2197_v43, %v408_v44 }
 0x227   :  { %v430_v48 = vadd.f32 %v2197_v43, %v407_v46  ;;  %v1517_v49 = vpop.f32.mrb[2].mxu1 }
 0x228   :  { %v410_v50 = vmul.f32 %v1517_v49, %v2192_v41  ;;  %v331_v51 = vpop.f32.mrb[3].mxu1  ;;  %v447_v54 = vmax.f32 %v431_v47, 0.0 }
 0x229   :  { %v446_v52 = vmax.f32 %v430_v48, 0.0  ;;  %v409_v53 = vmul.f32 %v2192_v41, %v331_v51 }
 0x22a   :  { %v433_v55 = vadd.f32 %v2197_v43, %v410_v50 }
 0x22b   :  { %v432_v56 = vadd.f32 %v2197_v43, %v409_v53  ;;  %v1520_v57 = vpop.f32.mrb[4].mxu1  ;;  %1568 = vmatprep.mubr.f32.mxu0 %v446_v52 }
 0x22c   :  { %v412_v58 = vmul.f32 %v1520_v57, %v2192_v41  ;;  %v341_v59 = vpop.f32.mrb[5].mxu1  ;;  %1569 = vmatmul.mubr.f32.vlgmr.msra.gmra.mrb[16].mxu0 %v447_v54  ;;  %v449_v62 = vmax.f32 %v433_v55, 0.0 }
 0x22d   :  { %v448_v60 = vmax.f32 %v432_v56, 0.0  ;;  %v411_v61 = vmul.f32 %v2192_v41, %v341_v59 }
 0x22e   :  { %v435_v63 = vadd.f32 %v2197_v43, %v412_v58 }
 0x22f   :  { %v434_v0 = vadd.f32 %v2197_v43, %v411_v61  ;;  %v1523_v1 = vpop.f32.mrb[6].mxu1  ;;  %1571 = vmatprep.mubr.f32.mxu0 %v448_v60  ;;  %v834_v61 = vld [vmem:[#allocation7 + $0x100] sm:$0xff] }
 0x230   :  { %v414_v2 = vmul.f32 %v1523_v1, %v2192_v41  ;;  %v351_v3 = vpop.f32.mrb[7].mxu1  ;;  %1572 = vmatmul.mubr.f32.gmra.mrb[18].mxu0 %v449_v62  ;;  %v451_v6 = vmax.f32 %v435_v63, 0.0  ;;  %v835_v62 = vld [vmem:[#allocation7 + $0x108] sm:$0xff]  ;;  %v836_v63 = vld [vmem:[#allocation7 + $0x110] sm:$0xff]  ;;  %v837_v1 = vld [vmem:[#allocation7 + $0x118] sm:$0xff] }
 0x231   :  { %v450_v4 = vmax.f32 %v434_v0, 0.0  ;;  %v413_v5 = vmul.f32 %v2192_v41, %v351_v3  ;;  %v1888_v0 = vpack.c.bf16 %v835_v62, %v834_v61  ;;  %v838_v3 = vld [vmem:[#allocation7 + $0x120] sm:$0xff] }
 0x232   :  { %v437_v7 = vadd.f32 %v2197_v43, %v414_v2  ;;  %v1892_v2 = vpack.c.bf16 %v837_v1, %v836_v63  ;;  %v2250_v61 = vld [vmem:[%s2364_s3 + $0x1] ss:$0 sm:$0xff] }
 0x233   :  { %v436_v8 = vadd.f32 %v2197_v43, %v413_v5  ;;  %v1526_v9 = vpop.f32.mrb[8].mxu1  ;;  %1574 = vmatprep.mubr.f32.mxu0 %v450_v4  ;;  %v839_v4 = vld [vmem:[#allocation7 + $0x128] sm:$0xff]  ;;  %1889 = vmatprep.subr.bf16.mxu0 %v1888_v0  ;;  %v840_v5 = vld [vmem:[#allocation7 + $0x130] sm:$0xff] }
 0x234   :  { %v416_v10 = vmul.f32 %v1526_v9, %v2192_v41  ;;  %v361_v11 = vpop.f32.mrb[9].mxu1  ;;  %1575 = vmatmul.mubr.f32.gmra.mrb[20].mxu0 %v451_v6  ;;  %v453_v14 = vmax.f32 %v437_v7, 0.0  ;;  %v842_v7 = vld [vmem:[#allocation7 + $0x140] sm:$0xff] }
 0x235   :  { %v452_v12 = vmax.f32 %v436_v8, 0.0  ;;  %v415_v13 = vmul.f32 %v2192_v41, %v361_v11  ;;  %1891 = vmatpush3.bf16.msra.mxu0 %v1888_v0  ;;  %v843_v8 = vld [vmem:[#allocation7 + $0x148] sm:$0xff]  ;;  %v845_v11 = vld [vmem:[#allocation7 + $0x158] sm:$0xff] }
 0x236   :  { %v439_v15 = vadd.f32 %v2197_v43, %v416_v10  ;;  %1893 = vmatprep.subr.bf16.mxu0 %v1892_v2  ;;  %v1904_v9 = vpack.c.bf16 %v843_v8, %v842_v7  ;;  %v844_v10 = vld [vmem:[#allocation7 + $0x150] sm:$0xff] }
 0x237   :  { %v438_v16 = vadd.f32 %v2197_v43, %v415_v13  ;;  %v1529_v17 = vpop.f32.mrb[10].mxu1  ;;  %1577 = vmatprep.mubr.f32.mxu0 %v452_v12  ;;  %v1908_v12 = vpack.c.bf16 %v845_v11, %v844_v10 }
 0x238   :  { %v418_v18 = vmul.f32 %v1529_v17, %v2192_v41  ;;  %v371_v34 = vpop.f32.mrb[11].mxu1  ;;  %1578 = vmatmul.mubr.f32.gmra.mrb[22].mxu0 %v453_v14  ;;  %v455_v37 = vmax.f32 %v439_v15, 0.0 }
 0x239   :  { %v454_v35 = vmax.f32 %v438_v16, 0.0  ;;  %v417_v36 = vmul.f32 %v2192_v41, %v371_v34  ;;  %1895 = vmatpush3.bf16.msra.mxu0 %v1892_v2 }
 0x23a   :  { %v441_v38 = vadd.f32 %v2197_v43, %v418_v18 }
 0x23b   :  { %v440_v39 = vadd.f32 %v2197_v43, %v417_v36  ;;  %v1532_v42 = vpop.f32.mrb[12].mxu1  ;;  %1580 = vmatprep.mubr.f32.mxu0 %v454_v35 }
 0x23c   :  { %v420_v44 = vmul.f32 %v1532_v42, %v2192_v41  ;;  %v381_v45 = vpop.f32.mrb[13].mxu1  ;;  %1581 = vmatmul.mubr.f32.gmra.mrb[24].mxu0 %v455_v37  ;;  %v457_v48 = vmax.f32 %v441_v38, 0.0 }
 0x23d   :  { %v456_v46 = vmax.f32 %v440_v39, 0.0  ;;  %v419_v47 = vmul.f32 %v2192_v41, %v381_v45 }
 0x23e   :  { %v443_v49 = vadd.f32 %v2197_v43, %v420_v44 }
 0x23f   :  { %v442_v50 = vadd.f32 %v2197_v43, %v419_v47  ;;  %v1535_v51 = vpop.f32.mrb[14].mxu1  ;;  %1583 = vmatprep.mubr.f32.mxu0 %v456_v46 }
 0x240   :  { %v422_v52 = vmul.f32 %v1535_v51, %v2192_v41  ;;  %v391_v53 = vpop.f32.mrb[15].mxu1  ;;  %1584 = vmatmul.mubr.f32.gmra.mrb[26].mxu0 %v457_v48  ;;  %v459_v56 = vmax.f32 %v443_v49, 0.0 }
 0x241   :  { %v458_v54 = vmax.f32 %v442_v50, 0.0  ;;  %v421_v55 = vmul.f32 %v2192_v41, %v391_v53  ;;  %v1896_v41 = vpack.c.bf16 %v839_v4, %v838_v3 }
 0x242   :  { %v445_v57 = vadd.f32 %v2197_v43, %v422_v52 }
 0x243   :  { %v444_v58 = vadd.f32 %v2197_v43, %v421_v55  ;;  %1586 = vmatprep.mubr.f32.mxu0 %v458_v54  ;;  %v841_v43 = vld [vmem:[#allocation7 + $0x138] sm:$0xff]  ;;  %1897 = vmatprep.subr.bf16.mxu0 %v1896_v41  ;;  %v846_v55 = vld [vmem:[#allocation7 + $0x160] sm:$0xff] }
 0x244   :  { %1587 = vmatmul.mubr.f32.gmra.mrb[28].mxu0 %v459_v56  ;;  %v461_v60 = vmax.f32 %v445_v57, 0.0  ;;  %v1900_v6 = vpack.c.bf16 %v841_v43, %v840_v5  ;;  %v847_v56 = vld [vmem:[#allocation7 + $0x168] sm:$0xff] }
 0x245   :  { %v460_v59 = vmax.f32 %v444_v58, 0.0  ;;  %1899 = vmatpush3.bf16.msra.mxu0 %v1896_v41  ;;  %v1912_v57 = vpack.c.bf16 %v847_v56, %v846_v55  ;;  %v848_v58 = vld [vmem:[#allocation7 + $0x170] sm:$0xff] }
 0x246   :  { %1901 = vmatprep.subr.bf16.mxu0 %v1900_v6 }
 0x247   :  { %1589 = vmatprep.mubr.f32.mxu0 %v460_v59  ;;  %v849_v59 = vld [vmem:[#allocation7 + $0x178] sm:$0xff] }
 0x248   :  { %1590 = vmatmul.mubr.f32.gmra.mrb[30].mxu0 %v461_v60  ;;  %v1916_v60 = vpack.c.bf16 %v849_v59, %v848_v58 }
 0x249   :  { %1903 = vmatpush3.bf16.msra.mxu0 %v1900_v6 }
 0x24a   :  { %1905 = vmatprep.subr.bf16.mxu0 %v1904_v9 }
 0x24d   :  { %1907 = vmatpush3.bf16.msra.mxu0 %v1904_v9 }
 0x24e   :  { %1909 = vmatprep.subr.bf16.mxu0 %v1908_v12 }
 0x251   :  { %1911 = vmatpush3.bf16.msra.mxu0 %v1908_v12 }
 0x252   :  { %1913 = vmatprep.subr.bf16.mxu0 %v1912_v57 }
 0x255   :  { %1915 = vmatpush3.bf16.msra.mxu0 %v1912_v57 }
 0x256   :  { %1917 = vmatprep.subr.bf16.mxu0 %v1916_v60 }
 0x259   :  { %1919 = vmatpush3.bf16.msra.mxu0 %v1916_v60 }
 0x2ff   :  { %v1570_v13 = vpop.f32.mrb[16].mxu0 }
 0x300   :  { %v545_v14 = vpop.f32.mrb[17].mxu0 }
 0x301   :  { %v1856_v15 = vpack.c.bf16 %v1570_v13, %v545_v14 }
 0x303   :  { %v1573_v16 = vpop.f32.mrb[18].mxu0  ;;  %1857 = vmatprep.subr.bf16.mxu1 %v1856_v15 }
 0x304   :  { %v555_v17 = vpop.f32.mrb[19].mxu0  ;;  %1859 = vmatpush3.bf16.msra.mxu1 %v1856_v15 }
 0x305   :  { %v1860_v18 = vpack.c.bf16 %v1573_v16, %v555_v17 }
 0x307   :  { %v1576_v34 = vpop.f32.mrb[20].mxu0  ;;  %1861 = vmatprep.subr.bf16.mxu1 %v1860_v18 }
 0x308   :  { %v565_v35 = vpop.f32.mrb[21].mxu0  ;;  %1863 = vmatpush3.bf16.msra.mxu1 %v1860_v18 }
 0x309   :  { %v1864_v36 = vpack.c.bf16 %v1576_v34, %v565_v35 }
 0x30b   :  { %v1579_v37 = vpop.f32.mrb[22].mxu0  ;;  %1865 = vmatprep.subr.bf16.mxu1 %v1864_v36 }
 0x30c   :  { %v575_v38 = vpop.f32.mrb[23].mxu0  ;;  %1867 = vmatpush3.bf16.msra.mxu1 %v1864_v36 }
 0x30d   :  { %v1868_v39 = vpack.c.bf16 %v1579_v37, %v575_v38 }
 0x30f   :  { %v1582_v42 = vpop.f32.mrb[24].mxu0  ;;  %1869 = vmatprep.subr.bf16.mxu1 %v1868_v39 }
 0x310   :  { %v585_v44 = vpop.f32.mrb[25].mxu0  ;;  %1871 = vmatpush3.bf16.msra.mxu1 %v1868_v39 }
 0x311   :  { %v1872_v45 = vpack.c.bf16 %v1582_v42, %v585_v44 }
 0x313   :  { %v1585_v46 = vpop.f32.mrb[26].mxu0  ;;  %1873 = vmatprep.subr.bf16.mxu1 %v1872_v45 }
 0x314   :  { %v595_v47 = vpop.f32.mrb[27].mxu0  ;;  %1875 = vmatpush3.bf16.msra.mxu1 %v1872_v45 }
 0x315   :  { %v1876_v48 = vpack.c.bf16 %v1585_v46, %v595_v47 }
 0x317   :  { %v1588_v49 = vpop.f32.mrb[28].mxu0  ;;  %1877 = vmatprep.subr.bf16.mxu1 %v1876_v48 }
 0x318   :  { %v605_v50 = vpop.f32.mrb[29].mxu0  ;;  %1879 = vmatpush3.bf16.msra.mxu1 %v1876_v48 }
 0x319   :  { %v1880_v51 = vpack.c.bf16 %v1588_v49, %v605_v50 }
 0x31b   :  { %v1591_v52 = vpop.f32.mrb[30].mxu0  ;;  %1881 = vmatprep.subr.bf16.mxu1 %v1880_v51 }
 0x31c   :  { %v615_v53 = vpop.f32.mrb[31].mxu0  ;;  %1883 = vmatpush3.bf16.msra.mxu1 %v1880_v51 }
 0x31d   :  { %v1884_v54 = vpack.c.bf16 %v1591_v52, %v615_v53 }
 0x31f   :  { %1885 = vmatprep.subr.bf16.mxu1 %v1884_v54 }
 0x320   :  { %1887 = vmatpush3.bf16.msra.mxu1 %v1884_v54 }
 0x323   :  { %1625 = vmatmul.mubr.f32.vlgmr.msra.gmra.mrb[16].mxu1 %v2143_v19 }
 0x324   :  { %1627 = vmatprep.mubr.f32.mxu1 %v2145_v20 }
 0x327   :  { %1628 = vmatmul.mubr.f32.gmra.mrb[18].mxu1 %v2149_v21 }
 0x328   :  { %1630 = vmatprep.mubr.f32.mxu1 %v2151_v22 }
 0x32b   :  { %1631 = vmatmul.mubr.f32.gmra.mrb[20].mxu1 %v2155_v23 }
 0x32c   :  { %1633 = vmatprep.mubr.f32.mxu1 %v2157_v24 }
 0x32f   :  { %1634 = vmatmul.mubr.f32.gmra.mrb[22].mxu1 %v2161_v25 }
 0x330   :  { %1636 = vmatprep.mubr.f32.mxu1 %v2163_v26 }
 0x333   :  { %1637 = vmatmul.mubr.f32.gmra.mrb[24].mxu1 %v2167_v27 }
 0x334   :  { %1639 = vmatprep.mubr.f32.mxu1 %v2169_v28 }
 0x337   :  { %1640 = vmatmul.mubr.f32.gmra.mrb[26].mxu1 %v2173_v29 }
 0x338   :  { %1642 = vmatprep.mubr.f32.mxu1 %v2175_v30 }
 0x33b   :  { %1643 = vmatmul.mubr.f32.gmra.mrb[28].mxu1 %v2179_v31 }
 0x33c   :  { %1645 = vmatprep.mubr.f32.mxu1 %v2181_v32 }
 0x33f   :  { %1646 = vmatmul.mubr.f32.gmra.mrb[30].mxu1 %v2185_v33 }
 0x340   :  { %1736 = vmatprep.mubr.f32.mxu1 %v2140_v40  ;;  %v2255_v40 = vld [vmem:[%s2365_s4 + $0x1] ss:$0 sm:$0xff] }
 0x3f6   :  { %v1626_v62 = vpop.f32.mrb[16].mxu1 }
 0x3f7   :  { %v778_v63 = vmul.f32 %v1626_v62, %v2250_v61  ;;  %v690_v0 = vpop.f32.mrb[17].mxu1 }
 0x3f8   :  { %v777_v1 = vmul.f32 %v2250_v61, %v690_v0 }
 0x3f9   :  { %v802_v2 = vadd.f32 %v2255_v40, %v778_v63 }
 0x3fa   :  { %v801_v3 = vadd.f32 %v2255_v40, %v777_v1  ;;  %v1629_v4 = vpop.f32.mrb[18].mxu1 }
 0x3fb   :  { %v780_v41 = vmul.f32 %v1629_v4, %v2250_v61  ;;  %v700_v5 = vpop.f32.mrb[19].mxu1  ;;  %v818_v7 = vmax.f32 %v802_v2, 0.0 }
 0x3fc   :  { %v817_v43 = vmax.f32 %v801_v3, 0.0  ;;  %v779_v6 = vmul.f32 %v2250_v61, %v700_v5 }
 0x3fd   :  { %v804_v8 = vadd.f32 %v2255_v40, %v780_v41 }
 0x3fe   :  { %v803_v9 = vadd.f32 %v2255_v40, %v779_v6  ;;  %v1632_v10 = vpop.f32.mrb[20].mxu1  ;;  %1680 = vmatprep.mubr.f32.mxu0 %v817_v43 }
 0x3ff   :  { %v782_v11 = vmul.f32 %v1632_v10, %v2250_v61  ;;  %v710_v12 = vpop.f32.mrb[21].mxu1  ;;  %1681 = vmatmul.mubr.f32.vlgmr.msra.gmra.mrb[32].mxu0 %v818_v7  ;;  %v820_v15 = vmax.f32 %v804_v8, 0.0 }
 0x400   :  { %v819_v13 = vmax.f32 %v803_v9, 0.0  ;;  %v781_v14 = vmul.f32 %v2250_v61, %v710_v12 }
 0x401   :  { %v806_v16 = vadd.f32 %v2255_v40, %v782_v11 }
 0x402   :  { %v805_v17 = vadd.f32 %v2255_v40, %v781_v14  ;;  %v1635_v18 = vpop.f32.mrb[22].mxu1  ;;  %1683 = vmatprep.mubr.f32.mxu0 %v819_v13 }
 0x403   :  { %v784_v34 = vmul.f32 %v1635_v18, %v2250_v61  ;;  %v720_v35 = vpop.f32.mrb[23].mxu1  ;;  %1684 = vmatmul.mubr.f32.gmra.mrb[34].mxu0 %v820_v15  ;;  %v822_v38 = vmax.f32 %v806_v16, 0.0 }
 0x404   :  { %v821_v36 = vmax.f32 %v805_v17, 0.0  ;;  %v783_v37 = vmul.f32 %v2250_v61, %v720_v35 }
 0x405   :  { %v808_v39 = vadd.f32 %v2255_v40, %v784_v34 }
 0x406   :  { %v807_v42 = vadd.f32 %v2255_v40, %v783_v37  ;;  %v1638_v44 = vpop.f32.mrb[24].mxu1  ;;  %1686 = vmatprep.mubr.f32.mxu0 %v821_v36 }
 0x407   :  { %v786_v45 = vmul.f32 %v1638_v44, %v2250_v61  ;;  %v730_v46 = vpop.f32.mrb[25].mxu1  ;;  %1687 = vmatmul.mubr.f32.gmra.mrb[36].mxu0 %v822_v38  ;;  %v824_v49 = vmax.f32 %v808_v39, 0.0 }
 0x408   :  { %v823_v47 = vmax.f32 %v807_v42, 0.0  ;;  %v785_v48 = vmul.f32 %v2250_v61, %v730_v46 }
 0x409   :  { %v810_v50 = vadd.f32 %v2255_v40, %v786_v45 }
 0x40a   :  { %v809_v51 = vadd.f32 %v2255_v40, %v785_v48  ;;  %v1641_v52 = vpop.f32.mrb[26].mxu1  ;;  %1689 = vmatprep.mubr.f32.mxu0 %v823_v47 }
 0x40b   :  { %v788_v53 = vmul.f32 %v1641_v52, %v2250_v61  ;;  %v740_v54 = vpop.f32.mrb[27].mxu1  ;;  %1690 = vmatmul.mubr.f32.gmra.mrb[38].mxu0 %v824_v49  ;;  %v826_v57 = vmax.f32 %v810_v50, 0.0 }
 0x40c   :  { %v825_v55 = vmax.f32 %v809_v51, 0.0  ;;  %v787_v56 = vmul.f32 %v2250_v61, %v740_v54 }
 0x40d   :  { %v812_v58 = vadd.f32 %v2255_v40, %v788_v53 }
 0x40e   :  { %v811_v59 = vadd.f32 %v2255_v40, %v787_v56  ;;  %v1644_v60 = vpop.f32.mrb[28].mxu1  ;;  %1692 = vmatprep.mubr.f32.mxu0 %v825_v55 }
 0x40f   :  { %v790_v62 = vmul.f32 %v1644_v60, %v2250_v61  ;;  %v750_v63 = vpop.f32.mrb[29].mxu1  ;;  %1693 = vmatmul.mubr.f32.gmra.mrb[40].mxu0 %v826_v57  ;;  %v828_v2 = vmax.f32 %v812_v58, 0.0 }
 0x410   :  { %v827_v0 = vmax.f32 %v811_v59, 0.0  ;;  %v789_v1 = vmul.f32 %v2250_v61, %v750_v63 }
 0x411   :  { %v814_v3 = vadd.f32 %v2255_v40, %v790_v62 }
 0x412   :  { %v813_v4 = vadd.f32 %v2255_v40, %v789_v1  ;;  %v1647_v41 = vpop.f32.mrb[30].mxu1  ;;  %1695 = vmatprep.mubr.f32.mxu0 %v827_v0 }
 0x413   :  { %v792_v5 = vmul.f32 %v1647_v41, %v2250_v61  ;;  %v760_v43 = vpop.f32.mrb[31].mxu1  ;;  %1696 = vmatmul.mubr.f32.gmra.mrb[42].mxu0 %v828_v2  ;;  %v830_v8 = vmax.f32 %v814_v3, 0.0 }
 0x414   :  { %v829_v6 = vmax.f32 %v813_v4, 0.0  ;;  %v791_v7 = vmul.f32 %v2250_v61, %v760_v43 }
 0x415   :  { %v816_v9 = vadd.f32 %v2255_v40, %v792_v5 }
 0x416   :  { %v815_v10 = vadd.f32 %v2255_v40, %v791_v7  ;;  %1698 = vmatprep.mubr.f32.mxu0 %v829_v6 }
 0x417   :  { %1699 = vmatmul.mubr.f32.gmra.mrb[44].mxu0 %v830_v8  ;;  %v832_v12 = vmax.f32 %v816_v9, 0.0 }
 0x418   :  { %v831_v11 = vmax.f32 %v815_v10, 0.0 }
 0x41a   :  { %1701 = vmatprep.mubr.f32.mxu0 %v831_v11 }
 0x41b   :  { %1702 = vmatmul.mubr.f32.gmra.mrb[46].mxu0 %v832_v12 }
 0x4d2   :  { %v1682_v13 = vpop.f32.mrb[32].mxu0 }
 0x4d3   :  { %v916_v14 = vpop.f32.mrb[33].mxu0 }
 0x4d4   :  { %v1920_v15 = vpack.c.bf16 %v1682_v13, %v916_v14 }
 0x4d6   :  { %v1685_v16 = vpop.f32.mrb[34].mxu0  ;;  %1921 = vmatprep.subr.bf16.mxu1 %v1920_v15 }
 0x4d7   :  { %v926_v17 = vpop.f32.mrb[35].mxu0  ;;  %1923 = vmatpush3.bf16.msra.mxu1 %v1920_v15 }
 0x4d8   :  { %v1924_v18 = vpack.c.bf16 %v1685_v16, %v926_v17 }
 0x4da   :  { %v1688_v61 = vpop.f32.mrb[36].mxu0  ;;  %1925 = vmatprep.subr.bf16.mxu1 %v1924_v18 }
 0x4db   :  { %v936_v34 = vpop.f32.mrb[37].mxu0  ;;  %1927 = vmatpush3.bf16.msra.mxu1 %v1924_v18 }
 0x4dc   :  { %v1928_v35 = vpack.c.bf16 %v1688_v61, %v936_v34 }
 0x4de   :  { %v1691_v40 = vpop.f32.mrb[38].mxu0  ;;  %1929 = vmatprep.subr.bf16.mxu1 %v1928_v35 }
 0x4df   :  { %v946_v36 = vpop.f32.mrb[39].mxu0  ;;  %1931 = vmatpush3.bf16.msra.mxu1 %v1928_v35 }
 0x4e0   :  { %v1932_v37 = vpack.c.bf16 %v1691_v40, %v946_v36 }
 0x4e2   :  { %v1694_v38 = vpop.f32.mrb[40].mxu0  ;;  %1933 = vmatprep.subr.bf16.mxu1 %v1932_v37 }
 0x4e3   :  { %v956_v39 = vpop.f32.mrb[41].mxu0  ;;  %1935 = vmatpush3.bf16.msra.mxu1 %v1932_v37 }
 0x4e4   :  { %v1936_v42 = vpack.c.bf16 %v1694_v38, %v956_v39 }
 0x4e6   :  { %v1697_v44 = vpop.f32.mrb[42].mxu0  ;;  %1937 = vmatprep.subr.bf16.mxu1 %v1936_v42 }
 0x4e7   :  { %v966_v45 = vpop.f32.mrb[43].mxu0  ;;  %1939 = vmatpush3.bf16.msra.mxu1 %v1936_v42 }
 0x4e8   :  { %v1940_v46 = vpack.c.bf16 %v1697_v44, %v966_v45 }
 0x4ea   :  { %v1700_v47 = vpop.f32.mrb[44].mxu0  ;;  %1941 = vmatprep.subr.bf16.mxu1 %v1940_v46 }
 0x4eb   :  { %v976_v48 = vpop.f32.mrb[45].mxu0  ;;  %1943 = vmatpush3.bf16.msra.mxu1 %v1940_v46 }
 0x4ec   :  { %v1944_v49 = vpack.c.bf16 %v1700_v47, %v976_v48 }
 0x4ee   :  { %v1703_v50 = vpop.f32.mrb[46].mxu0  ;;  %1945 = vmatprep.subr.bf16.mxu1 %v1944_v49 }
 0x4ef   :  { %v986_v51 = vpop.f32.mrb[47].mxu0  ;;  %1947 = vmatpush3.bf16.msra.mxu1 %v1944_v49 }
 0x4f0   :  { %v1948_v52 = vpack.c.bf16 %v1703_v50, %v986_v51 }
 0x4f2   :  { %1949 = vmatprep.subr.bf16.mxu1 %v1948_v52 }
 0x4f3   :  { %1951 = vmatpush3.bf16.msra.mxu1 %v1948_v52 }
 0x4f6   :  { %1737 = vmatmul.mubr.f32.vlgmr.msra.gmra.mrb[32].mxu1 %v2143_v19  ;;  %v2307_v19 = vld [vmem:[%s2364_s3 + $0x2] ss:$0 sm:$0xff]  ;;  %s2057_s3 = smov [#allocation8]  }
 0x4f7   :  { %1739 = vmatprep.mubr.f32.mxu1 %v2145_v20 }
 0x4fa   :  { %1740 = vmatmul.mubr.f32.gmra.mrb[34].mxu1 %v2149_v21  ;;  %v2312_v21 = vld [vmem:[%s2365_s4 + $0x2] ss:$0 sm:$0xff]  ;;  %s1209_s4 = sshll.u32 %s2057_s3, 4  ;;  %s1210_s4 = int_to_ptr.vmem [resolvable:$true] %s1209_s4 }
 0x4fb   :  { %1742 = vmatprep.mubr.f32.mxu1 %v2151_v22  ;;  %s2024_s1 = scalar_lea.vmem %s1210_s4, 2048  ;;  %p2029_p11 = scmp.lt.s32.totalorder %s1210_s4, %s1210_s4 }
 0x4fc   :  { %p2025_p10 = scmp.ne.s32.totalorder %s1210_s4, %s2024_s1  ;;  %p2030_p12 = scmp.lt.s32.totalorder %s2024_s1, %s2024_s1 }
 0x4fe   :  { %1743 = vmatmul.mubr.f32.gmra.mrb[36].mxu1 %v2155_v23  ;;  %p2031_p13 = por %p2030_p12, %p2029_p11 }
 0x4ff   :  { %1745 = vmatprep.mubr.f32.mxu1 %v2157_v24 }
 0x500   :  { %p2032_p0 = pnand %p2031_p13, %p2025_p10 }
 0x502   :  { %1746 = vmatmul.mubr.f32.gmra.mrb[38].mxu1 %v2161_v25 }
 0x503   :  { %1748 = vmatprep.mubr.f32.mxu1 %v2163_v26 }
 0x506   :  { %1749 = vmatmul.mubr.f32.gmra.mrb[40].mxu1 %v2167_v27 }
 0x507   :  { %1751 = vmatprep.mubr.f32.mxu1 %v2169_v28 }
 0x50a   :  { %1752 = vmatmul.mubr.f32.gmra.mrb[42].mxu1 %v2173_v29 }
 0x50b   :  { %1754 = vmatprep.mubr.f32.mxu1 %v2175_v30 }
 0x50e   :  { %1755 = vmatmul.mubr.f32.gmra.mrb[44].mxu1 %v2179_v31 }
 0x50f   :  { %1757 = vmatprep.mubr.f32.mxu1 %v2181_v32 }
 0x512   :  { %1758 = vmatmul.mubr.f32.gmra.mrb[46].mxu1 %v2185_v33 }
 0x5c9   :  { %v1738_v20 = vpop.f32.mrb[32].mxu1 }
 0x5ca   :  { %v1149_v22 = vmul.f32 %v1738_v20, %v2307_v19  ;;  %v1061_v23 = vpop.f32.mrb[33].mxu1 }
 0x5cb   :  { %v1148_v24 = vmul.f32 %v2307_v19, %v1061_v23 }
 0x5cc   :  { %v1173_v25 = vadd.f32 %v2312_v21, %v1149_v22 }
 0x5cd   :  { %v1172_v26 = vadd.f32 %v2312_v21, %v1148_v24  ;;  %v1741_v27 = vpop.f32.mrb[34].mxu1 }
 0x5ce   :  { %1189 = vst [vmem:[#allocation8 + $0x8] sm:$0xff] %v1173_v25  ;;  %v1151_v28 = vmul.f32 %v1741_v27, %v2307_v19  ;;  %v1071_v29 = vpop.f32.mrb[35].mxu1 }
 0x5cf   :  { %1188 = vst [vmem:[#allocation8] sm:$0xff] %v1172_v26  ;;  %v1150_v30 = vmul.f32 %v2307_v19, %v1071_v29 }
 0x5d0   :  { %v1175_v31 = vadd.f32 %v2312_v21, %v1151_v28 }
 0x5d1   :  { %v1174_v32 = vadd.f32 %v2312_v21, %v1150_v30  ;;  %v1744_v33 = vpop.f32.mrb[36].mxu1 }
 0x5d2   :  { %1191 = vst [vmem:[#allocation8 + $0x18] sm:$0xff] %v1175_v31  ;;  %v1153_v53 = vmul.f32 %v1744_v33, %v2307_v19  ;;  %v1081_v54 = vpop.f32.mrb[37].mxu1 }
 0x5d3   :  { %1190 = vst [vmem:[#allocation8 + $0x10] sm:$0xff] %v1174_v32  ;;  %v1152_v55 = vmul.f32 %v2307_v19, %v1081_v54 }
 0x5d4   :  { %v1177_v56 = vadd.f32 %v2312_v21, %v1153_v53 }
 0x5d5   :  { %v1176_v57 = vadd.f32 %v2312_v21, %v1152_v55  ;;  %v1747_v58 = vpop.f32.mrb[38].mxu1 }
 0x5d6   :  { %1193 = vst [vmem:[#allocation8 + $0x28] sm:$0xff] %v1177_v56  ;;  %v1155_v59 = vmul.f32 %v1747_v58, %v2307_v19  ;;  %v1091_v60 = vpop.f32.mrb[39].mxu1 }
 0x5d7   :  { %1192 = vst [vmem:[#allocation8 + $0x20] sm:$0xff] %v1176_v57  ;;  %v1154_v62 = vmul.f32 %v2307_v19, %v1091_v60 }
 0x5d8   :  { %v1179_v63 = vadd.f32 %v2312_v21, %v1155_v59 }
 0x5d9   :  { %v1178_v0 = vadd.f32 %v2312_v21, %v1154_v62  ;;  %v1750_v1 = vpop.f32.mrb[40].mxu1 }
 0x5da   :  { %1195 = vst [vmem:[#allocation8 + $0x38] sm:$0xff] %v1179_v63  ;;  %v1157_v2 = vmul.f32 %v1750_v1, %v2307_v19  ;;  %v1101_v3 = vpop.f32.mrb[41].mxu1 }
 0x5db   :  { %1194 = vst [vmem:[#allocation8 + $0x30] sm:$0xff] %v1178_v0  ;;  %v1156_v4 = vmul.f32 %v2307_v19, %v1101_v3 }
 0x5dc   :  { %v1181_v41 = vadd.f32 %v2312_v21, %v1157_v2 }
 0x5dd   :  { %v1180_v5 = vadd.f32 %v2312_v21, %v1156_v4  ;;  %v1753_v43 = vpop.f32.mrb[42].mxu1 }
 0x5de   :  { %1197 = vst [vmem:[#allocation8 + $0x48] sm:$0xff] %v1181_v41  ;;  %v1159_v6 = vmul.f32 %v1753_v43, %v2307_v19  ;;  %v1111_v7 = vpop.f32.mrb[43].mxu1 }
 0x5df   :  { %1196 = vst [vmem:[#allocation8 + $0x40] sm:$0xff] %v1180_v5  ;;  %v1158_v8 = vmul.f32 %v2307_v19, %v1111_v7 }
 0x5e0   :  { %v1183_v9 = vadd.f32 %v2312_v21, %v1159_v6 }
 0x5e1   :  { %v1182_v10 = vadd.f32 %v2312_v21, %v1158_v8  ;;  %v1756_v11 = vpop.f32.mrb[44].mxu1 }
 0x5e2   :  { %1199 = vst [vmem:[#allocation8 + $0x58] sm:$0xff] %v1183_v9  ;;  %v1161_v12 = vmul.f32 %v1756_v11, %v2307_v19  ;;  %v1121_v13 = vpop.f32.mrb[45].mxu1 }
 0x5e3   :  { %1198 = vst [vmem:[#allocation8 + $0x50] sm:$0xff] %v1182_v10  ;;  %v1160_v14 = vmul.f32 %v2307_v19, %v1121_v13 }
 0x5e4   :  { %v1185_v15 = vadd.f32 %v2312_v21, %v1161_v12 }
 0x5e5   :  { %v1184_v16 = vadd.f32 %v2312_v21, %v1160_v14  ;;  %v1759_v17 = vpop.f32.mrb[46].mxu1 }
 0x5e6   :  { %1201 = vst [vmem:[#allocation8 + $0x68] sm:$0xff] %v1185_v15  ;;  %v1163_v18 = vmul.f32 %v1759_v17, %v2307_v19  ;;  %v1131_v61 = vpop.f32.mrb[47].mxu1 }
 0x5e7   :  { %1200 = vst [vmem:[#allocation8 + $0x60] sm:$0xff] %v1184_v16  ;;  %v1162_v34 = vmul.f32 %v2307_v19, %v1131_v61 }
 0x5e8   :  { %v1187_v35 = vadd.f32 %v2312_v21, %v1163_v18 }
 0x5e9   :  { %v1186_v40 = vadd.f32 %v2312_v21, %v1162_v34 }
 0x5ea   :  { %1203 = vst [vmem:[#allocation8 + $0x78] sm:$0xff] %v1187_v35 }
 0x5eb   :  { %1202 = vst [vmem:[#allocation8 + $0x70] sm:$0xff] %v1186_v40 }
 0x5ec   :  { %2035 = shalt.err (!%p2032_p0)
}
 0x5ed   :  { %s2036_s19 = scalar_lea.hbm %s2366_s5, 2048 }
 0x5ee   :  { %p2037_p1 = scmp.ne.s32.totalorder %s2366_s5, %s2036_s19  ;;  %p2040_p2 = scmp.lt.u32.totalorder %s2036_s19, %s2366_s5 }
 0x5f0   :  { %p2042_p3 = pnand %p2040_p2, %p2037_p1 }
 0x5f2   :  { %2045 = shalt.err (!%p2042_p3)
}
 0x5f3   :  { %1215 = dma.vmem_to_hbm [thread:$0]  %s1210_s4, 2048, %s2366_s5, [#allocation4], %s2054_s30, %s2054_s30, %s2055_s6  }
 0x5f4   :  { %2050 = dma.done.wait [#allocation4], 2048  }
 0x5f5   :  { %2051 = vsyncadd [#allocation4], 4294965248 }
 0x5f6   :  { %1219 = vsyncpa [#allocation3], 1 }
 0x5f7   :  { %1220 = vsyncpa [#allocation6], 1 }
 0x5f8   :  { %1221 = vsyncpa [#allocation4], 1 }

</bundles_post_ra>
